<compile_context>
chip_gen: v6e
topology: v6e:2x2x1
jax: 0.10.0
libtpu: 0.0.40
codegen_flags: <defaults>
</compile_context>

<pallas_src>
import jax
import jax.numpy as jnp
from jax.experimental import pallas as pl
from jax.experimental.pallas import tpu as pltpu


# ---------------------------------------------------------------------------
# Kernel: fused (folded) 3-layer MLP, one batch tile per grid step.
# ---------------------------------------------------------------------------
def decoder_kernel(x_ref,                 # (BM, latent + c_in)  bf16
                   w0_ref, b0_ref,        # (latent + c_in, h0) bf16 , (1, h0) f32
                   w1_ref, b1_ref,        # (h0, h1) bf16 , (1, h1) f32
                   w2_ref, b2_ref,        # (h1, out) bf16 , (1, out) f32
                   out_ref):              # (BM, out) f32
    # L0 (linear_dim_red already folded into w0/b0) + ReLU
    h = (jnp.dot(x_ref[...], w0_ref[...], preferred_element_type=jnp.float32)
         + b0_ref[...])
    h = jnp.maximum(h, 0.0)

    # L1 + ReLU
    h = (jnp.dot(h.astype(jnp.bfloat16), w1_ref[...],
                 preferred_element_type=jnp.float32)
         + b1_ref[...])
    h = jnp.maximum(h, 0.0)

    # L2 + Sigmoid
    h = (jnp.dot(h.astype(jnp.bfloat16), w2_ref[...],
                 preferred_element_type=jnp.float32)
         + b2_ref[...])
    out_ref[...] = jax.nn.sigmoid(h)


# ---------------------------------------------------------------------------
# Wrapper
# ---------------------------------------------------------------------------
def fold_decoder_params(params):
    """Fold linear_dim_red into layer 0 (exact) and cast weights to bf16.

    h0 = z @ W0z + (c @ Wred + bred) @ W0c + b0
       = [z, c] @ [[W0z], [Wred @ W0c]] + (bred @ W0c + b0)
    """
    w0c_folded = params["wred"] @ params["w0c"]              # (c_in, h0), f32
    b0_folded = params["bred"] @ params["w0c"] + params["b0"]
    w0 = jnp.concatenate([params["w0z"], w0c_folded], axis=0)  # (latent+c_in, h0)
    return {
        "w0": w0.astype(jnp.bfloat16), "b0": b0_folded.astype(jnp.float32),
        "w1": params["w1"].astype(jnp.bfloat16), "b1": params["b1"].astype(jnp.float32),
        "w2": params["w2"].astype(jnp.bfloat16), "b2": params["b2"].astype(jnp.float32),
    }


def decoder_forward(z, c, folded, *, block_batch=128):
    """Fused Pallas forward for the Decoder.

    z: (B, latent_size) f32, c: (B, layer_sizes[0]) f32.
    folded: output of fold_decoder_params.
    """
    B = z.shape[0]
    out_dim = folded["w2"].shape[1]

    # cat([z, c]) once in the wrapper; bf16 halves the activation DMA bytes.
    x = jnp.concatenate([z, c], axis=-1).astype(jnp.bfloat16)
    in_dim = x.shape[1]

    # Batch tile: multiple of 8 (sublane) unless it covers the full batch.
    # Sized well under the v7x 64 MiB VMEM budget (per-row footprint here is
    # well under 1 KB even double-buffered).
    bm = min(block_batch, B)
    if bm != B:
        bm = max(8, (bm // 8) * 8)
    grid = (pl.cdiv(B, bm),)

    def resident(arr):
        # Constant block index: weight/bias stays resident in VMEM, no re-DMA.
        return pl.BlockSpec(arr.shape, lambda i: (0,) * arr.ndim)

    weights = (folded["w0"], folded["b0"],
               folded["w1"], folded["b1"],
               folded["w2"], folded["b2"])

    return pl.pallas_call(
        decoder_kernel,
        out_shape=jax.ShapeDtypeStruct((B, out_dim), jnp.float32),
        grid=grid,
        in_specs=[pl.BlockSpec((bm, in_dim), lambda i: (i, 0))]
                 + [resident(w) for w in weights],
        out_specs=pl.BlockSpec((bm, out_dim), lambda i: (i, 0)),
        compiler_params=pltpu.CompilerParams(
            dimension_semantics=("parallel",)),
    )(x, *weights)


# ---------------------------------------------------------------------------
# Parameter construction (PyTorch-equivalent layout) and pure-JAX reference
# ---------------------------------------------------------------------------
def make_params(key, layer_sizes, latent_size, num_labels):
    """Deterministic synthetic parameters, shapes matching the PyTorch module.

    Weights stored as (in, out) (transposed nn.Linear), biases as (1, out).
    """
    keys = jax.random.split(key, 8)

    def lin(kw, kb, n_in, n_out):
        w = jax.random.normal(kw, (n_in, n_out), jnp.float32) * 0.1
        b = jax.random.normal(kb, (1, n_out), jnp.float32) * 0.1
        return w, b

    # linear_dim_red: Linear(layer_sizes[0], num_labels)
    wred, bred = lin(keys[0], keys[1], layer_sizes[0], num_labels)
    # L0: Linear(latent + num_labels, layer_sizes[0]) -- split into z / c parts
    w0, b0 = lin(keys[2], keys[3], latent_size + num_labels, layer_sizes[0])
    # L1: Linear(layer_sizes[0], layer_sizes[1])
    w1, b1 = lin(keys[4], keys[5], layer_sizes[0], layer_sizes[1])
    # L2 (sigmoid output): Linear(layer_sizes[1], layer_sizes[2])
    w2, b2 = lin(keys[6], keys[7], layer_sizes[1], layer_sizes[2])

    return {
        "wred": wred, "bred": bred,
        "w0z": w0[:latent_size, :], "w0c": w0[latent_size:, :], "b0": b0,
        "w1": w1, "b1": b1,
        "w2": w2, "b2": b2,
    }


def decoder_reference(z, c, p):
    """Pure-JAX f32 reference mirroring the PyTorch forward exactly."""
    c_red = c @ p["wred"] + p["bred"]
    x = jnp.concatenate([z, c_red], axis=-1)
    w0 = jnp.concatenate([p["w0z"], p["w0c"]], axis=0)
    h = jnp.maximum(x @ w0 + p["b0"], 0.0)
    h = jnp.maximum(h @ p["w1"] + p["b1"], 0.0)
    return jax.nn.sigmoid(h @ p["w2"] + p["b2"])


if __name__ == "__main__":
    # Module hyper-parameters (small, consistent with the forward pass):
    layer_sizes = [32, 64, 16]     # MLP widths; last layer gets Sigmoid
    latent_size = 8
    num_labels = 4
    batch = 64                     # small, but exercises the batch-tiled grid

    key = jax.random.PRNGKey(0)
    k_z, k_c, k_p = jax.random.split(key, 3)

    z = jax.random.normal(k_z, (batch, latent_size), jnp.float32)
    c = jax.random.normal(k_c, (batch, layer_sizes[0]), jnp.float32)
    params = make_params(k_p, layer_sizes, latent_size, num_labels)
    folded = fold_decoder_params(params)

    out = decoder_forward(z, c, folded, block_batch=32)   # grid of 2 batch tiles
    out = jax.block_until_ready(out)

    ref = decoder_reference(z, c, params)
    assert out.shape == (batch, layer_sizes[-1])
    # bf16 matmul operands vs f32 reference -> loosened tolerance.
    assert jnp.allclose(out, ref, atol=2e-2, rtol=2e-2), "mismatch vs reference"

    print("KERNEL_OK")
</pallas_src>

<mosaic_0001>
module attributes {stable_mosaic.version = 11 : i64} {
  func.func @decoder_kernel(%arg0: i32, %arg1: memref<32x40xbf16, #tpu.memory_space<vmem>>, %arg2: memref<40x32xbf16, #tpu.memory_space<vmem>>, %arg3: memref<1x32xf32, #tpu.memory_space<vmem>>, %arg4: memref<32x64xbf16, #tpu.memory_space<vmem>>, %arg5: memref<1x64xf32, #tpu.memory_space<vmem>>, %arg6: memref<64x16xbf16, #tpu.memory_space<vmem>>, %arg7: memref<1x16xf32, #tpu.memory_space<vmem>>, %arg8: memref<32x16xf32, #tpu.memory_space<vmem>>) attributes {dimension_semantics = [#tpu.dimension_semantics<parallel>], iteration_bounds = array<i64: 2>, scalar_prefetch = 0 : i64, scratch_operands = 0 : i64, tpu.core_type = #tpu.core_type<tc>, window_params = [{transform_indices = @transform_0, window_bounds = array<i64: 32, 40>}, {pipeline_mode = #tpu.pipeline_mode<synchronous>, transform_indices = @transform_1, window_bounds = array<i64: 40, 32>}, {pipeline_mode = #tpu.pipeline_mode<synchronous>, transform_indices = @transform_2, window_bounds = array<i64: 1, 32>}, {pipeline_mode = #tpu.pipeline_mode<synchronous>, transform_indices = @transform_3, window_bounds = array<i64: 32, 64>}, {pipeline_mode = #tpu.pipeline_mode<synchronous>, transform_indices = @transform_4, window_bounds = array<i64: 1, 64>}, {pipeline_mode = #tpu.pipeline_mode<synchronous>, transform_indices = @transform_5, window_bounds = array<i64: 64, 16>}, {pipeline_mode = #tpu.pipeline_mode<synchronous>, transform_indices = @transform_6, window_bounds = array<i64: 1, 16>}, {transform_indices = @transform_7, window_bounds = array<i64: 32, 16>}]} {
    %c0 = arith.constant 0 : index
    %c0_0 = arith.constant 0 : index
    %0 = vector.load %arg1[%c0, %c0_0] : memref<32x40xbf16, #tpu.memory_space<vmem>>, vector<32x40xbf16>
    %c0_1 = arith.constant 0 : index
    %c0_2 = arith.constant 0 : index
    %1 = vector.load %arg2[%c0_1, %c0_2] : memref<40x32xbf16, #tpu.memory_space<vmem>>, vector<40x32xbf16>
    %cst = arith.constant dense<0.000000e+00> : vector<32x32xf32>
    %2 = tpu.matmul %0, %1, %cst {dimension_numbers = #tpu.dot_dimension_numbers<[1], [0], [0], [1], [0, 0, 1, 1], [], []>} : vector<32x40xbf16>, vector<40x32xbf16>, vector<32x32xf32> -> vector<32x32xf32>
    %c0_3 = arith.constant 0 : index
    %c0_4 = arith.constant 0 : index
    %3 = vector.load %arg3[%c0_3, %c0_4] : memref<1x32xf32, #tpu.memory_space<vmem>>, vector<1x32xf32>
    %4 = vector.broadcast %3 : vector<1x32xf32> to vector<32x32xf32>
    %5 = arith.addf %2, %4 : vector<32x32xf32>
    %cst_5 = arith.constant 0.000000e+00 : f32
    %6 = vector.broadcast %cst_5 : f32 to vector<32x32xf32>
    %7 = arith.maximumf %5, %6 : vector<32x32xf32>
    %8 = arith.truncf %7 : vector<32x32xf32> to vector<32x32xbf16>
    %c0_6 = arith.constant 0 : index
    %c0_7 = arith.constant 0 : index
    %9 = vector.load %arg4[%c0_6, %c0_7] : memref<32x64xbf16, #tpu.memory_space<vmem>>, vector<32x64xbf16>
    %cst_8 = arith.constant dense<0.000000e+00> : vector<32x64xf32>
    %10 = tpu.matmul %8, %9, %cst_8 {dimension_numbers = #tpu.dot_dimension_numbers<[1], [0], [0], [1], [0, 0, 1, 1], [], []>} : vector<32x32xbf16>, vector<32x64xbf16>, vector<32x64xf32> -> vector<32x64xf32>
    %c0_9 = arith.constant 0 : index
    %c0_10 = arith.constant 0 : index
    %11 = vector.load %arg5[%c0_9, %c0_10] : memref<1x64xf32, #tpu.memory_space<vmem>>, vector<1x64xf32>
    %12 = vector.broadcast %11 : vector<1x64xf32> to vector<32x64xf32>
    %13 = arith.addf %10, %12 : vector<32x64xf32>
    %cst_11 = arith.constant 0.000000e+00 : f32
    %14 = vector.broadcast %cst_11 : f32 to vector<32x64xf32>
    %15 = arith.maximumf %13, %14 : vector<32x64xf32>
    %16 = arith.truncf %15 : vector<32x64xf32> to vector<32x64xbf16>
    %c0_12 = arith.constant 0 : index
    %c0_13 = arith.constant 0 : index
    %17 = vector.load %arg6[%c0_12, %c0_13] : memref<64x16xbf16, #tpu.memory_space<vmem>>, vector<64x16xbf16>
    %cst_14 = arith.constant dense<0.000000e+00> : vector<32x16xf32>
    %18 = tpu.matmul %16, %17, %cst_14 {dimension_numbers = #tpu.dot_dimension_numbers<[1], [0], [0], [1], [0, 0, 1, 1], [], []>} : vector<32x64xbf16>, vector<64x16xbf16>, vector<32x16xf32> -> vector<32x16xf32>
    %c0_15 = arith.constant 0 : index
    %c0_16 = arith.constant 0 : index
    %19 = vector.load %arg7[%c0_15, %c0_16] : memref<1x16xf32, #tpu.memory_space<vmem>>, vector<1x16xf32>
    %20 = vector.broadcast %19 : vector<1x16xf32> to vector<32x16xf32>
    %21 = arith.addf %18, %20 : vector<32x16xf32>
    %22 = arith.negf %21 : vector<32x16xf32>
    %23 = math.exp %22 : vector<32x16xf32>
    %cst_17 = arith.constant 1.000000e+00 : f32
    %24 = vector.broadcast %cst_17 : f32 to vector<32x16xf32>
    %25 = arith.addf %24, %23 : vector<32x16xf32>
    %26 = arith.divf %24, %25 : vector<32x16xf32>
    %c0_18 = arith.constant 0 : index
    %c0_19 = arith.constant 0 : index
    %27 = vector.load %arg8[%c0_18, %c0_19] : memref<32x16xf32, #tpu.memory_space<vmem>>, vector<32x16xf32>
    tpu.vector_store %arg8[%c0_18, %c0_19], %26 {strides = array<i32>} : memref<32x16xf32, #tpu.memory_space<vmem>>, vector<32x16xf32>,
    return
  }
  func.func @transform_0(%arg0: i32) -> (i32, i32) {
    %c0_i32 = arith.constant 0 : i32
    %c0_i32_0 = arith.constant 0 : i32
    return %arg0, %c0_i32 : i32, i32
  }
  func.func @transform_1(%arg0: i32) -> (i32, i32) {
    %c0_i32 = arith.constant 0 : i32
    %c0_i32_0 = arith.constant 0 : i32
    %c0_i32_1 = arith.constant 0 : i32
    return %c0_i32, %c0_i32_0 : i32, i32
  }
  func.func @transform_2(%arg0: i32) -> (i32, i32) {
    %c0_i32 = arith.constant 0 : i32
    %c0_i32_0 = arith.constant 0 : i32
    %c0_i32_1 = arith.constant 0 : i32
    return %c0_i32, %c0_i32_0 : i32, i32
  }
  func.func @transform_3(%arg0: i32) -> (i32, i32) {
    %c0_i32 = arith.constant 0 : i32
    %c0_i32_0 = arith.constant 0 : i32
    %c0_i32_1 = arith.constant 0 : i32
    return %c0_i32, %c0_i32_0 : i32, i32
  }
  func.func @transform_4(%arg0: i32) -> (i32, i32) {
    %c0_i32 = arith.constant 0 : i32
    %c0_i32_0 = arith.constant 0 : i32
    %c0_i32_1 = arith.constant 0 : i32
    return %c0_i32, %c0_i32_0 : i32, i32
  }
  func.func @transform_5(%arg0: i32) -> (i32, i32) {
    %c0_i32 = arith.constant 0 : i32
    %c0_i32_0 = arith.constant 0 : i32
    %c0_i32_1 = arith.constant 0 : i32
    return %c0_i32, %c0_i32_0 : i32, i32
  }
  func.func @transform_6(%arg0: i32) -> (i32, i32) {
    %c0_i32 = arith.constant 0 : i32
    %c0_i32_0 = arith.constant 0 : i32
    %c0_i32_1 = arith.constant 0 : i32
    return %c0_i32, %c0_i32_0 : i32, i32
  }
  func.func @transform_7(%arg0: i32) -> (i32, i32) {
    %c0_i32 = arith.constant 0 : i32
    %c0_i32_0 = arith.constant 0 : i32
    return %arg0, %c0_i32 : i32, i32
  }
}

</mosaic_0001>

<bundles_post_ra>
// kernel: tpu_custom_call.1
= control target key start
LH: loop header
LB: loop body
LE: loop exit
PB: predicated region body
PF: predicated region fallthrough
CT: control target
= control target key end

     0   :  { %s819_s24 = smov 0   ;;  %s876_s0 = inlined_call_operand.vmem [shape: bf16[64,40], index: 0, kind: input, shape index: {}]   ;;  %s877_s1 = inlined_call_operand.vmem [shape: bf16[40,32], index: 1, kind: input, shape index: {}]   ;;  %s878_s2 = inlined_call_operand.vmem [shape: f32[1,32], index: 2, kind: input, shape index: {}]   ;;  %s879_s3 = inlined_call_operand.vmem [shape: bf16[32,64], index: 3, kind: input, shape index: {}]   ;;  %s880_s4 = inlined_call_operand.vmem [shape: f32[1,64], index: 4, kind: input, shape index: {}]   ;;  %s881_s5 = inlined_call_operand.vmem [shape: bf16[64,16], index: 5, kind: input, shape index: {}]   ;;  %s882_s6 = inlined_call_operand.vmem [shape: f32[1,16], index: 6, kind: input, shape index: {}]   ;;  %s883_s7 = inlined_call_operand.vmem [shape: f32[64,16], index: 7, kind: output, shape index: {}]  }
   0x1 LB: > { %s655_s25 = sadd.s32 4294967295, %s777_s24   ;;  %p659_p0 = scmp.ge.s32.totalorder %s777_s24, 1  ;;  %s777_s24 = sphi %s819_s24, %s17_s24  }
   0x2   : > { %p238_p1 = scmp.lt.s32.totalorder %s777_s24, 3 }
   0x4   : > { %p239_p2 = pnand %p659_p0, %p238_p1 }
   0x5   : > { %s660_s30 = sshll.u32 (!%p239_p2), %s655_s25, 2 }
   0x6   : > { %242 = sbr.rel (%p239_p2) target bundleno = 672 (0x2a0), region = 48  ;;  %p271_p3 = scmp.lt.s32.totalorder (!%p239_p2), %s660_s30, 7 }
   0xb   : > { %v744_v0 = vld [vmem:[%s877_s1 + $0x10] ss:$0 sps:$4 sm:$0xff]   ;;  %vm331_vm0 = vcmask 1043456   ;;  %v745_v1 = vld [vmem:[%s877_s1 + $0x8] sm:$0xff]   ;;  %v746_v3 = vld [vmem:[%s877_s1] sm:$0xff]   ;;  %s885_s30 = smov (!%p271_p3, %s660_s30), 7 }
   0xc   : > { %735 = vmatprep.subr.msk.bf16.mxu0 %vm331_vm0, %v744_v0  ;;  %v333_v2 = vsel %vm331_vm0, %v744_v0, 0  ;;  %s661_s10 = sshll.u32 %s885_s30, 2  ;;  %vm324_vm1 = vcmask 326656   ;;  %v749_v6 = vld [vmem:[%s879_s3 + $0x8] sm:$0xff]   ;;  %v750_v7 = vld [vmem:[%s879_s3] sm:$0xff]   ;;  %v751_v8 = vld [vmem:[%s881_s5 + $0x18] sm:$0xff]  }
   0xd   : > { %706 = vmatpush3.bf16.msra.mxu0 %v333_v2  ;;  %s274_s13 = scalar_lea.vmem %s876_s0, %s661_s10  ;;  %723 = vmatprep.subr.bf16.mxu1 %v751_v8  ;;  %v664_v11 = vld [vmem:[%s878_s2] ss:$0 sm:$0xff]  ;;  %vm413_vm2 = vcmask 261120   ;;  %v752_v24 = vld [vmem:[%s881_s5 + $0x10] sm:$0xff]   ;;  %v753_v25 = vld [vmem:[%s881_s5 + $0x8] sm:$0xff]   ;;  %vm514_vm3 = vcmask 523264  }
   0xe   : > { %707 = vmatprep.subr.bf16.mxu0 %v745_v1  ;;  %v747_v4 = vld [vmem:[%s274_s13] sm:$0xff]   ;;  %v748_v5 = vld [vmem:[%s274_s13 + $0x8] sm:$0xff]   ;;  %724 = vmatpush3.bf16.msra.mxu1 %v751_v8  ;;  %s663_s11 = sshll.u32 %s885_s30, 3  ;;  %vm594_vm4 = vcmask 130048  }
   0xf   : > { %711 = vmatprep.mubr.msk.bf16.mxu0 %vm324_vm1, %v747_v4  ;;  %725 = vmatprep.subr.bf16.mxu1 %v752_v24  ;;  %v754_v26 = vld [vmem:[%s881_s5] sm:$0xff]   ;;  %s280_s14 = scalar_lea.vmem %s883_s7, %s663_s11 }
  0x10   : > { %v672_v29 = vld [vmem:[%s880_s4] ss:$0 sm:$0xff] }
  0x11   : > { %708 = vmatpush3.bf16.msra.mxu0 %v745_v1  ;;  %v677_v42 = vld [vmem:[%s882_s6] ss:$0 sm:$0xff] }
  0x12   : > { %709 = vmatprep.subr.bf16.mxu0 %v746_v3  ;;  %726 = vmatpush3.bf16.msra.mxu1 %v752_v24 }
  0x13   : > { %727 = vmatprep.subr.bf16.mxu1 %v753_v25 }
  0x15   : > { %710 = vmatpush3.bf16.msra.mxu0 %v746_v3 }
  0x16   : > { %715 = vmatprep.subr.bf16.mxu0 %v749_v6  ;;  %728 = vmatpush3.bf16.msra.mxu1 %v753_v25 }
  0x17   : > { %729 = vmatprep.subr.bf16.mxu1 %v754_v26 }
  0x18   : > { %712 = vmatmul.mubr.msk.bf16.vlgmr.msra.gmra.mxu0 %vm324_vm1, %v748_v5 }
  0x19   : > { %716 = vmatpush3.bf16.msra.mxu0 %v749_v6 }
  0x1a   : > { %717 = vmatprep.subr.bf16.mxu0 %v750_v7  ;;  %730 = vmatpush3.bf16.msra.mxu1 %v754_v26 }
  0x1d   : > { %718 = vmatpush3.bf16.msra.mxu0 %v750_v7 }
  0xd8   : > { %v713_v9 = vpop.f32.mrf.mxu0 }
  0xd9   : > { %v378_v15 = vadd.f32 %v713_v9, %v664_v11 }
  0xda   : > { %v369_v10 = vpop.f32.mrf.mxu0 }
  0xdb   : > { %v370_v13 = vadd.f32 %v664_v11, %v369_v10  ;;  %v386_v21 = vmax.f32 %v378_v15, 0.0 }
  0xdc   : > { %v714_v12 = vpop.f32.mrf.mxu0 }
  0xdd   : > { %v381_v14 = vadd.f32 %v714_v12, %v664_v11  ;;  %v384_v19 = vmax.f32 %v370_v13, 0.0 }
  0xde   : > { %v372_v16 = vpop.f32.mrf.mxu0 }
  0xdf   : > { %v373_v17 = vadd.f32 %v664_v11, %v372_v16  ;;  %v387_v18 = vmax.f32 %v381_v14, 0.0 }
  0xe1   : > { %v385_v20 = vmax.f32 %v373_v17, 0.0  ;;  %v389_v23 = vpack.c.bf16 %v387_v18, %v386_v21 }
  0xe3   : > { %v388_v22 = vpack.c.bf16 %v385_v20, %v384_v19 }
  0xe5   : > { %719 = vmatprep.mubr.msk.bf16.mxu0 %vm413_vm2, %v388_v22 }
  0xe6   : > { %720 = vmatmul.mubr.msk.bf16.vlgmr.msra.gmra.mxu0 %vm413_vm2, %v389_v23 }
 0x1a6   : > { %v721_v27 = vpop.f32.mrf.mxu0 }
 0x1a7   : > { %v463_v33 = vadd.f32 %v721_v27, %v672_v29 }
 0x1a8   : > { %v454_v28 = vpop.f32.mrf.mxu0 }
 0x1a9   : > { %v455_v31 = vadd.f32 %v672_v29, %v454_v28  ;;  %v471_v39 = vmax.f32 %v463_v33, 0.0 }
 0x1aa   : > { %v722_v30 = vpop.f32.mrf.mxu0 }
 0x1ab   : > { %v466_v32 = vadd.f32 %v722_v30, %v672_v29  ;;  %v469_v37 = vmax.f32 %v455_v31, 0.0 }
 0x1ac   : > { %v457_v34 = vpop.f32.mrf.mxu0 }
 0x1ad   : > { %v458_v35 = vadd.f32 %v672_v29, %v457_v34  ;;  %v472_v36 = vmax.f32 %v466_v32, 0.0 }
 0x1af   : > { %v470_v38 = vmax.f32 %v458_v35, 0.0  ;;  %v474_v41 = vpack.c.bf16 %v472_v36, %v471_v39 }
 0x1b1   : > { %v473_v40 = vpack.c.bf16 %v470_v38, %v469_v37 }
 0x1b3   : > { %731 = vmatprep.mubr.msk.bf16.mxu1 %vm514_vm3, %v473_v40 }
 0x1b4   : > { %732 = vmatmul.mubr.msk.bf16.vlgmr.msra.gmra.mxu1 %vm514_vm3, %v474_v41 }
 0x274   : > { %v733_v43 = vpop.f32.mrf.mxu1 }
 0x275   : > { %v564_v44 = vadd.f32 %v733_v43, %v677_v42 }
 0x276   : > { %v555_v45 = vpop.f32.mrf.mxu1 }
 0x277   : > { %v556_v46 = vadd.f32 %v677_v42, %v555_v45  ;;  %v686_v47 = vmul.f32 -1.442695, %v564_v44 }
 0x278   : > { %v734_v48 = vpop.f32.mrf.mxu1 }
 0x279   : > { %v684_v49 = vmul.f32 -1.442695, %v556_v46  ;;  %v567_v50 = vadd.f32 %v734_v48, %v677_v42 }
 0x27a   : > { %v558_v51 = vpop.f32.mrf.mxu1 }
 0x27b   : > { %755 = vpow2.f32 %v684_v49  ;;  %v687_v52 = vmul.f32 -1.442695, %v567_v50  ;;  %v559_v53 = vadd.f32 %v677_v42, %v558_v51 }
 0x27c   : > { %757 = vpow2.f32 %v686_v47 }
 0x27d   : > { %759 = vpow2.f32 %v687_v52  ;;  %v685_v54 = vmul.f32 -1.442695, %v559_v53 }
 0x27f   : > { %761 = vpow2.f32 %v685_v54 }
 0x288   : > { %v756_v55 = vpop.eup %755 }
 0x289   : > { %v758_v56 = vpop.eup %757  ;;  %v582_v57 = vadd.f32 1.0, %v756_v55 }
 0x28a   : > { %v760_v58 = vpop.eup %759  ;;  %v584_v60 = vadd.f32 1.0, %v758_v56 }
 0x28b   : > { %763 = vrcp.f32 %v582_v57  ;;  %v585_v61 = vadd.f32 1.0, %v760_v58 }
 0x28c   : > { %v762_v59 = vpop.eup %761 }
 0x28d   : > { %v583_v62 = vadd.f32 1.0, %v762_v59 }
 0x28f   : > { %765 = vrcp.f32 %v583_v62 }
 0x290   : > { %767 = vrcp.f32 %v584_v60 }
 0x291   : > { %769 = vrcp.f32 %v585_v61 }
 0x298   : > { %v764_v63 = vpop.eup %763 }
 0x299   : > { %595 = vst.msk [vmem:[%s280_s14] sm:$0xff] %vm594_vm4, %v764_v63 }
 0x29c   : > { %v766_v0 = vpop.eup %765 }
 0x29d   : > { %v768_v1 = vpop.eup %767  ;;  %596 = vst.msk [vmem:[%s280_s14 + $0x8] sm:$0xff] %vm594_vm4, %v766_v0 }
 0x29e   : > { %v770_v2 = vpop.eup %769  ;;  %597 = vst.msk [vmem:[%s280_s14 + $0x10] sm:$0xff] %vm594_vm4, %v768_v1 }
 0x29f   : > { %598 = vst.msk [vmem:[%s280_s14 + $0x18] sm:$0xff] %vm594_vm4, %v770_v2 }
 0x2a0 PF: > { %s17_s24 = sadd.s32 1, %s777_s24  }
 0x2a1   : > { %p14_p4 = scmp.ge.s32.totalorder %s17_s24, 4  }
 0x2a3   :  { %16 = sbr.rel (!%p14_p4) target bundleno = 1 (0x1), region = 78 }

</bundles_post_ra>
